<compile_context>
chip_gen: v7x
topology: tpu7x:2x2x1
jax: 0.10.0
libtpu: 0.0.40
codegen_flags: <defaults>
</compile_context>

<pallas_src>
import functools

import jax
import jax.numpy as jnp
from jax.experimental import pallas as pl
from jax.experimental.pallas import tpu as pltpu


def _attention_kernel(v_ref, k_ref, q_ref, mb_ref,
                      wv_ref, wk_ref, wq_ref, wo_ref, b_ref,
                      o_ref, *, block_batch, qs, embed, use_bf16_matmul):
    bt = block_batch
    key_len = v_ref.shape[1]

    # Flatten the batch block into the M (sublane) dimension so each
    # projection is a single matmul instead of bt tiny ones.
    v = v_ref[...].reshape(bt * key_len, embed)      # (bt*L, E)
    k = k_ref[...].reshape(bt * key_len, embed)      # (bt*L, E)
    q = q_ref[...].reshape(bt * qs, embed)           # (bt*QS, E)
    mask_bias = mb_ref[...]                          # (bt, 1, L) additive bias

    # Linear projections (bias=False): x @ W^T ; W^T passed pre-transposed.
    vp = jnp.dot(v, wv_ref[...],
                 preferred_element_type=jnp.float32).reshape(bt, key_len, embed)
    kp = jnp.dot(k, wk_ref[...],
                 preferred_element_type=jnp.float32).reshape(bt, key_len, embed)
    # 1/sqrt(embed) is already folded into wq_ref in the wrapper.
    qp = jnp.dot(q, wq_ref[...],
                 preferred_element_type=jnp.float32).reshape(bt, qs, embed)

    if use_bf16_matmul:
        qp_m, kp_m = qp.astype(jnp.bfloat16), kp.astype(jnp.bfloat16)
    else:
        qp_m, kp_m = qp, kp

    # energy[n,h,q,k,s] is identical across heads -> compute once per batch
    # element, flattened over (q, s).  Batched MXU matmul over the batch block.
    energy = jnp.einsum('bqe,bke->bqk', qp_m, kp_m,
                        preferred_element_type=jnp.float32)      # (bt, QS, L)

    # Additive mask bias: 0 where visible, -1e20 where mask == 0.
    scaled = energy + mask_bias

    # Softmax over the key axis (dim=3 of (n,h,q,k,s)) == last axis here.
    mx = jnp.max(scaled, axis=-1, keepdims=True)
    ex = jnp.exp(scaled - mx)
    denom = jnp.sum(ex, axis=-1, keepdims=True)
    att = ex * pl.reciprocal(denom, approx=True)                 # (bt, QS, L)

    if use_bf16_matmul:
        att_m, vp_m = att.astype(jnp.bfloat16), vp.astype(jnp.bfloat16)
    else:
        att_m, vp_m = att, vp

    # context = attention @ V  (same for every head).
    ctx = jnp.einsum('bqk,bke->bqe', att_m, vp_m,
                     preferred_element_type=jnp.float32)         # (bt, QS, E)

    # fc_out with head-folded weight:
    #   concat([ctx]*heads, -1) @ Wo^T == ctx @ (sum_h Wo^T block h)
    out = jnp.dot(ctx.reshape(bt * qs, embed), wo_ref[...],
                  preferred_element_type=jnp.float32) + b_ref[...]
    o_ref[...] = out.reshape(bt, qs, embed)


def _pick_block_batch(n, max_block=8):
    """Largest divisor of n (<= max_block) that leaves >= 2 grid steps.

    Keeping >= 2 'parallel' grid steps ensures both v7x TensorCores get work.
    """
    best = 1
    for bt in range(1, min(n, max_block) + 1):
        if n % bt != 0:
            continue
        if n // bt >= 2 or n == 1:
            best = bt
    return best


def word_label_attention(values, keys, query, mask, params, *, heads,
                         block_batch=None, use_bf16_matmul=False):
    """Pallas implementation of WordLabelAttention.forward."""
    wv, wk, wq, wo, bo = params                 # PyTorch nn.Linear layout: (out, in)
    N, L, E = values.shape
    _, Q, S, _ = query.shape
    QS = Q * S

    if block_batch is None:
        block_batch = _pick_block_batch(N)
    bt = block_batch
    assert N % bt == 0, "block_batch must divide the batch size"

    q_flat = query.reshape(N, QS, E).astype(jnp.float32)
    v_in = values.astype(jnp.float32)
    k_in = keys.astype(jnp.float32)

    # Additive mask bias (exact masked_fill semantics: nonzero mask = visible).
    if mask is None:
        mbias = jnp.zeros((N, 1, L), jnp.float32)
    else:
        mbias = jnp.where(mask == 0, jnp.float32(-1e20),
                          jnp.float32(0.0)).reshape(N, 1, L)

    # Weight prep (wrapper-side, done once):
    scale = jnp.float32(E) ** jnp.float32(-0.5)
    wv_t = wv.T.astype(jnp.float32)                              # (E, E)
    wk_t = wk.T.astype(jnp.float32)                              # (E, E)
    wq_t = (wq.T.astype(jnp.float32) * scale)                    # fold 1/sqrt(E)
    # Fold identical heads into a single (E, E) output projection.
    wo_folded = wo.T.astype(jnp.float32).reshape(heads, E, E).sum(axis=0)
    bo_r = bo.reshape(1, E).astype(jnp.float32)

    kernel = functools.partial(
        _attention_kernel, block_batch=bt, qs=QS, embed=E,
        use_bf16_matmul=use_bf16_matmul)

    out_flat = pl.pallas_call(
        kernel,
        out_shape=jax.ShapeDtypeStruct((N, QS, E), jnp.float32),
        grid_spec=pltpu.PrefetchScalarGridSpec(
            num_scalar_prefetch=0,
            grid=(N // bt,),
            in_specs=[
                pl.BlockSpec((bt, L, E), lambda n: (n, 0, 0)),   # values
                pl.BlockSpec((bt, L, E), lambda n: (n, 0, 0)),   # keys
                pl.BlockSpec((bt, QS, E), lambda n: (n, 0, 0)),  # query (flat)
                pl.BlockSpec((bt, 1, L), lambda n: (n, 0, 0)),   # mask bias
                pl.BlockSpec((E, E), lambda n: (0, 0)),          # Wv^T
                pl.BlockSpec((E, E), lambda n: (0, 0)),          # Wk^T
                pl.BlockSpec((E, E), lambda n: (0, 0)),          # Wq^T (scaled)
                pl.BlockSpec((E, E), lambda n: (0, 0)),          # Wo^T (head-folded)
                pl.BlockSpec((1, E), lambda n: (0, 0)),          # bias
            ],
            out_specs=pl.BlockSpec((bt, QS, E), lambda n: (n, 0, 0)),
        ),
        compiler_params=pltpu.CompilerParams(
            dimension_semantics=("parallel",)),
    )(v_in, k_in, q_flat, mbias, wv_t, wk_t, wq_t, wo_folded, bo_r)

    return out_flat.reshape(N, Q, S, E)


def reference_forward(values, keys, query, mask, params, *, heads):
    """Pure-JAX mirror of the PyTorch forward (for verification)."""
    wv, wk, wq, wo, bo = params
    N, L, E = values.shape
    _, Q, S, _ = query.shape
    v = jnp.broadcast_to(values[:, :, None, :], (N, L, heads, E))
    k = jnp.broadcast_to(keys[:, :, None, :], (N, L, heads, E))
    q = jnp.broadcast_to(query[:, :, :, None, :], (N, Q, S, heads, E))
    v = v @ wv.T
    k = k @ wk.T
    q = q @ wq.T
    energy = jnp.einsum('nqshd,nkhd->nhqks', q, k)
    m = mask[:, None, None, :, None]
    energy = jnp.where(m == 0, -1e20, energy)
    att = jax.nn.softmax(energy / (E ** 0.5), axis=3)
    out = jnp.einsum('nhqls,nlhd->nqshd', att, v).reshape(N, Q, S, heads * E)
    return out @ wo.T + bo


if __name__ == "__main__":
    # Small shapes consistent with the module's forward.
    N, heads, E = 2, 2, 32          # embed_size = head_dim = 32
    Q, S = 4, 8                      # query_len, query_seq_len
    L = 8                            # key_len == value_len

    key = jax.random.PRNGKey(0)
    k1, k2, k3, k4, k5, k6, k7, k8 = jax.random.split(key, 8)

    values = jax.random.normal(k1, (N, L, E), jnp.float32)
    keys_in = jax.random.normal(k2, (N, L, E), jnp.float32)
    query = jax.random.normal(k3, (N, Q, S, E), jnp.float32)
    # Mask over keys: zero out the last two key positions of batch 1.
    mask = jnp.ones((N, L), jnp.int32).at[1, -2:].set(0)

    # Deterministic parameter init (shapes from nn.Linear: (out, in)).
    wv = 0.05 * jax.random.normal(k4, (E, E), jnp.float32)
    wk = 0.05 * jax.random.normal(k5, (E, E), jnp.float32)
    wq = 0.05 * jax.random.normal(k6, (E, E), jnp.float32)
    wo = 0.05 * jax.random.normal(k7, (E, heads * E), jnp.float32)
    bo = 0.05 * jax.random.normal(k8, (E,), jnp.float32)
    params = (wv, wk, wq, wo, bo)

    ref = reference_forward(values, keys_in, query, mask, params, heads=heads)

    # Default (f32 MXU operands) path — tight tolerance.
    out = word_label_attention(values, keys_in, query, mask, params, heads=heads)
    out = jax.block_until_ready(out)
    assert out.shape == (N, Q, S, E)
    assert jnp.allclose(out, ref, atol=1e-3, rtol=1e-3), "mismatch vs reference (f32)"

    # bf16 MXU-operand fast path (v6e/v7x) — f32 accumulation/softmax, looser tol.
    out_bf16 = word_label_attention(values, keys_in, query, mask, params,
                                    heads=heads, use_bf16_matmul=True)
    out_bf16 = jax.block_until_ready(out_bf16)
    assert jnp.allclose(out_bf16, ref, atol=2e-2, rtol=2e-2), "mismatch vs reference (bf16)"

    print("KERNEL_OK")
</pallas_src>

<mosaic_0001>
module attributes {stable_mosaic.version = 11 : i64} {
  func.func @_attention_kernel(%arg0: i32, %arg1: memref<1x8x32xf32, #tpu.memory_space<vmem>>, %arg2: memref<1x8x32xf32, #tpu.memory_space<vmem>>, %arg3: memref<1x32x32xf32, #tpu.memory_space<vmem>>, %arg4: memref<1x1x8xf32, #tpu.memory_space<vmem>>, %arg5: memref<32x32xf32, #tpu.memory_space<vmem>>, %arg6: memref<32x32xf32, #tpu.memory_space<vmem>>, %arg7: memref<32x32xf32, #tpu.memory_space<vmem>>, %arg8: memref<32x32xf32, #tpu.memory_space<vmem>>, %arg9: memref<1x32xf32, #tpu.memory_space<vmem>>, %arg10: memref<1x32x32xf32, #tpu.memory_space<vmem>>) attributes {dimension_semantics = [#tpu.dimension_semantics<parallel>], iteration_bounds = array<i64: 2>, scalar_prefetch = 0 : i64, scratch_operands = 0 : i64, tpu.core_type = #tpu.core_type<tc>, window_params = [{transform_indices = @transform_0, window_bounds = array<i64: 1, 8, 32>}, {transform_indices = @transform_1, window_bounds = array<i64: 1, 8, 32>}, {transform_indices = @transform_2, window_bounds = array<i64: 1, 32, 32>}, {transform_indices = @transform_3, window_bounds = array<i64: 1, 1, 8>}, {pipeline_mode = #tpu.pipeline_mode<synchronous>, transform_indices = @transform_4, window_bounds = array<i64: 32, 32>}, {pipeline_mode = #tpu.pipeline_mode<synchronous>, transform_indices = @transform_5, window_bounds = array<i64: 32, 32>}, {pipeline_mode = #tpu.pipeline_mode<synchronous>, transform_indices = @transform_6, window_bounds = array<i64: 32, 32>}, {pipeline_mode = #tpu.pipeline_mode<synchronous>, transform_indices = @transform_7, window_bounds = array<i64: 32, 32>}, {pipeline_mode = #tpu.pipeline_mode<synchronous>, transform_indices = @transform_8, window_bounds = array<i64: 1, 32>}, {transform_indices = @transform_9, window_bounds = array<i64: 1, 32, 32>}]} {
    %c0 = arith.constant 0 : index
    %c0_0 = arith.constant 0 : index
    %c0_1 = arith.constant 0 : index
    %0 = vector.load %arg1[%c0, %c0_0, %c0_1] : memref<1x8x32xf32, #tpu.memory_space<vmem>>, vector<1x8x32xf32>
    %1 = vector.shape_cast %0 : vector<1x8x32xf32> to vector<8x32xf32>
    %c0_2 = arith.constant 0 : index
    %c0_3 = arith.constant 0 : index
    %c0_4 = arith.constant 0 : index
    %2 = vector.load %arg2[%c0_2, %c0_3, %c0_4] : memref<1x8x32xf32, #tpu.memory_space<vmem>>, vector<1x8x32xf32>
    %3 = vector.shape_cast %2 : vector<1x8x32xf32> to vector<8x32xf32>
    %c0_5 = arith.constant 0 : index
    %c0_6 = arith.constant 0 : index
    %c0_7 = arith.constant 0 : index
    %4 = vector.load %arg3[%c0_5, %c0_6, %c0_7] : memref<1x32x32xf32, #tpu.memory_space<vmem>>, vector<1x32x32xf32>
    %5 = vector.shape_cast %4 : vector<1x32x32xf32> to vector<32x32xf32>
    %c0_8 = arith.constant 0 : index
    %c0_9 = arith.constant 0 : index
    %c0_10 = arith.constant 0 : index
    %6 = vector.load %arg4[%c0_8, %c0_9, %c0_10] : memref<1x1x8xf32, #tpu.memory_space<vmem>>, vector<1x1x8xf32>
    %c0_11 = arith.constant 0 : index
    %c0_12 = arith.constant 0 : index
    %7 = vector.load %arg5[%c0_11, %c0_12] : memref<32x32xf32, #tpu.memory_space<vmem>>, vector<32x32xf32>
    %cst = arith.constant dense<0.000000e+00> : vector<8x32xf32>
    %8 = tpu.matmul %1, %7, %cst {dimension_numbers = #tpu.dot_dimension_numbers<[1], [0], [0], [1], [0, 0, 1, 1], [], []>} : vector<8x32xf32>, vector<32x32xf32>, vector<8x32xf32> -> vector<8x32xf32>
    %9 = vector.shape_cast %8 : vector<8x32xf32> to vector<1x8x32xf32>
    %c0_13 = arith.constant 0 : index
    %c0_14 = arith.constant 0 : index
    %10 = vector.load %arg6[%c0_13, %c0_14] : memref<32x32xf32, #tpu.memory_space<vmem>>, vector<32x32xf32>
    %cst_15 = arith.constant dense<0.000000e+00> : vector<8x32xf32>
    %11 = tpu.matmul %3, %10, %cst_15 {dimension_numbers = #tpu.dot_dimension_numbers<[1], [0], [0], [1], [0, 0, 1, 1], [], []>} : vector<8x32xf32>, vector<32x32xf32>, vector<8x32xf32> -> vector<8x32xf32>
    %12 = vector.shape_cast %11 : vector<8x32xf32> to vector<1x8x32xf32>
    %c0_16 = arith.constant 0 : index
    %c0_17 = arith.constant 0 : index
    %13 = vector.load %arg7[%c0_16, %c0_17] : memref<32x32xf32, #tpu.memory_space<vmem>>, vector<32x32xf32>
    %cst_18 = arith.constant dense<0.000000e+00> : vector<32x32xf32>
    %14 = tpu.matmul %5, %13, %cst_18 {dimension_numbers = #tpu.dot_dimension_numbers<[1], [0], [0], [1], [0, 0, 1, 1], [], []>} : vector<32x32xf32>, vector<32x32xf32>, vector<32x32xf32> -> vector<32x32xf32>
    %15 = vector.shape_cast %14 : vector<32x32xf32> to vector<1x32x32xf32>
    "tpu.trace_start"() <{level = 10 : i32, message = "bqe,bke->bqk"}> : () -> ()
    %cst_19 = arith.constant dense<0.000000e+00> : vector<1x32x8xf32>
    %16 = tpu.matmul %15, %12, %cst_19 {dimension_numbers = #tpu.dot_dimension_numbers<[2], [2], [1], [1], [0, 0, 0, 1, 1, 1], [0], [0]>} : vector<1x32x32xf32>, vector<1x8x32xf32>, vector<1x32x8xf32> -> vector<1x32x8xf32>
    "tpu.trace_stop"() : () -> ()
    %17 = vector.broadcast %6 : vector<1x1x8xf32> to vector<1x32x8xf32>
    %18 = arith.addf %16, %17 : vector<1x32x8xf32>
    %cst_20 = arith.constant dense<0xFF800000> : vector<1x32xf32>
    %19 = vector.multi_reduction <maximumf>, %18, %cst_20 [2] : vector<1x32x8xf32> to vector<1x32xf32>
    %20 = vector.shape_cast %19 : vector<1x32xf32> to vector<1x32x1xf32>
    %21 = vector.broadcast %20 : vector<1x32x1xf32> to vector<1x32x8xf32>
    %22 = arith.subf %18, %21 : vector<1x32x8xf32>
    %23 = math.exp %22 : vector<1x32x8xf32>
    %cst_21 = arith.constant dense<0.000000e+00> : vector<1x32xf32>
    %24 = vector.multi_reduction <add>, %23, %cst_21 [2] : vector<1x32x8xf32> to vector<1x32xf32>
    %25 = vector.shape_cast %24 : vector<1x32xf32> to vector<1x32x1xf32>
    %26 = tpu.reciprocal %25 {approx = true} : vector<1x32x1xf32> -> vector<1x32x1xf32>
    %27 = vector.broadcast %26 : vector<1x32x1xf32> to vector<1x32x8xf32>
    %28 = arith.mulf %23, %27 : vector<1x32x8xf32>
    "tpu.trace_start"() <{level = 10 : i32, message = "bqk,bke->bqe"}> : () -> ()
    %cst_22 = arith.constant dense<0.000000e+00> : vector<1x32x32xf32>
    %29 = tpu.matmul %28, %9, %cst_22 {dimension_numbers = #tpu.dot_dimension_numbers<[2], [1], [1], [2], [0, 0, 0, 1, 1, 2], [0], [0]>} : vector<1x32x8xf32>, vector<1x8x32xf32>, vector<1x32x32xf32> -> vector<1x32x32xf32>
    "tpu.trace_stop"() : () -> ()
    %30 = vector.shape_cast %29 : vector<1x32x32xf32> to vector<32x32xf32>
    %c0_23 = arith.constant 0 : index
    %c0_24 = arith.constant 0 : index
    %31 = vector.load %arg8[%c0_23, %c0_24] : memref<32x32xf32, #tpu.memory_space<vmem>>, vector<32x32xf32>
    %cst_25 = arith.constant dense<0.000000e+00> : vector<32x32xf32>
    %32 = tpu.matmul %30, %31, %cst_25 {dimension_numbers = #tpu.dot_dimension_numbers<[1], [0], [0], [1], [0, 0, 1, 1], [], []>} : vector<32x32xf32>, vector<32x32xf32>, vector<32x32xf32> -> vector<32x32xf32>
    %c0_26 = arith.constant 0 : index
    %c0_27 = arith.constant 0 : index
    %33 = vector.load %arg9[%c0_26, %c0_27] : memref<1x32xf32, #tpu.memory_space<vmem>>, vector<1x32xf32>
    %34 = vector.broadcast %33 : vector<1x32xf32> to vector<32x32xf32>
    %35 = arith.addf %32, %34 : vector<32x32xf32>
    %36 = vector.shape_cast %35 : vector<32x32xf32> to vector<1x32x32xf32>
    %c0_28 = arith.constant 0 : index
    %c0_29 = arith.constant 0 : index
    %c0_30 = arith.constant 0 : index
    %37 = vector.load %arg10[%c0_28, %c0_29, %c0_30] : memref<1x32x32xf32, #tpu.memory_space<vmem>>, vector<1x32x32xf32>
    tpu.vector_store %arg10[%c0_28, %c0_29, %c0_30], %36 {strides = array<i32>} : memref<1x32x32xf32, #tpu.memory_space<vmem>>, vector<1x32x32xf32>,
    return
  }
  func.func @transform_0(%arg0: i32) -> (i32, i32, i32) {
    %c0_i32 = arith.constant 0 : i32
    %c0_i32_0 = arith.constant 0 : i32
    %c0_i32_1 = arith.constant 0 : i32
    return %arg0, %c0_i32, %c0_i32_0 : i32, i32, i32
  }
  func.func @transform_1(%arg0: i32) -> (i32, i32, i32) {
    %c0_i32 = arith.constant 0 : i32
    %c0_i32_0 = arith.constant 0 : i32
    %c0_i32_1 = arith.constant 0 : i32
    return %arg0, %c0_i32, %c0_i32_0 : i32, i32, i32
  }
  func.func @transform_2(%arg0: i32) -> (i32, i32, i32) {
    %c0_i32 = arith.constant 0 : i32
    %c0_i32_0 = arith.constant 0 : i32
    %c0_i32_1 = arith.constant 0 : i32
    return %arg0, %c0_i32, %c0_i32_0 : i32, i32, i32
  }
  func.func @transform_3(%arg0: i32) -> (i32, i32, i32) {
    %c0_i32 = arith.constant 0 : i32
    %c0_i32_0 = arith.constant 0 : i32
    %c0_i32_1 = arith.constant 0 : i32
    return %arg0, %c0_i32, %c0_i32_0 : i32, i32, i32
  }
  func.func @transform_4(%arg0: i32) -> (i32, i32) {
    %c0_i32 = arith.constant 0 : i32
    %c0_i32_0 = arith.constant 0 : i32
    %c0_i32_1 = arith.constant 0 : i32
    return %c0_i32, %c0_i32_0 : i32, i32
  }
  func.func @transform_5(%arg0: i32) -> (i32, i32) {
    %c0_i32 = arith.constant 0 : i32
    %c0_i32_0 = arith.constant 0 : i32
    %c0_i32_1 = arith.constant 0 : i32
    return %c0_i32, %c0_i32_0 : i32, i32
  }
  func.func @transform_6(%arg0: i32) -> (i32, i32) {
    %c0_i32 = arith.constant 0 : i32
    %c0_i32_0 = arith.constant 0 : i32
    %c0_i32_1 = arith.constant 0 : i32
    return %c0_i32, %c0_i32_0 : i32, i32
  }
  func.func @transform_7(%arg0: i32) -> (i32, i32) {
    %c0_i32 = arith.constant 0 : i32
    %c0_i32_0 = arith.constant 0 : i32
    %c0_i32_1 = arith.constant 0 : i32
    return %c0_i32, %c0_i32_0 : i32, i32
  }
  func.func @transform_8(%arg0: i32) -> (i32, i32) {
    %c0_i32 = arith.constant 0 : i32
    %c0_i32_0 = arith.constant 0 : i32
    %c0_i32_1 = arith.constant 0 : i32
    return %c0_i32, %c0_i32_0 : i32, i32
  }
  func.func @transform_9(%arg0: i32) -> (i32, i32, i32) {
    %c0_i32 = arith.constant 0 : i32
    %c0_i32_0 = arith.constant 0 : i32
    %c0_i32_1 = arith.constant 0 : i32
    return %arg0, %c0_i32, %c0_i32_0 : i32, i32, i32
  }
}

</mosaic_0001>

<bundles_post_ra>
// kernel: tpu_custom_call.1
= control target key start
LH: loop header
LB: loop body
LE: loop exit
PB: predicated region body
PF: predicated region fallthrough
CT: control target
= control target key end

     0   :  { %s2369_s0 = inlined_call_operand.hbm [shape: f32[2,8,32], index: 0, kind: input, shape index: {}]   ;;  %s2370_s1 = inlined_call_operand.hbm [shape: f32[2,8,32], index: 1, kind: input, shape index: {}]   ;;  %s2371_s2 = inlined_call_operand.hbm [shape: f32[2,32,32], index: 2, kind: input, shape index: {}]   ;;  %s2372_s3 = inlined_call_operand.vmem [shape: f32[2,1,8], index: 3, kind: input, shape index: {}]   ;;  %s2373_s4 = inlined_call_operand.hbm [shape: f32[32,32], index: 4, kind: input, shape index: {}]   ;;  %s2374_s5 = inlined_call_operand.hbm [shape: f32[32,32], index: 5, kind: input, shape index: {}]   ;;  %s2375_s6 = inlined_call_operand.hbm [shape: f32[32,32], index: 6, kind: input, shape index: {}]   ;;  %s2376_s7 = inlined_call_operand.hbm [shape: f32[32,32], index: 7, kind: input, shape index: {}]   ;;  %s2377_s8 = inlined_call_operand.vmem [shape: f32[1,32], index: 8, kind: input, shape index: {}]   ;;  %s2378_s9 = inlined_call_operand.hbm [shape: f32[2,32,32], index: 9, kind: output, shape index: {}]  }
   0x1   :  { %2405 = sst [smem:[#allocation26_spill]] %s2370_s1 }
   0x2   :  { %2406 = sst [smem:[#allocation27_spill]] %s2373_s4 }
   0x3   :  { %2407 = sst [smem:[#allocation28_spill]] %s2375_s6 }
   0x4   :  { %2408 = sst [smem:[#allocation29_spill]] %s2377_s8 }
   0x5   :  { %2409 = sst [smem:[#allocation30_spill]] %s2378_s9 }
   0x6   :  { %14 = vsyncpa [#allocation3], 0 }
   0x7   :  { %16 = vsyncpa [#allocation3 + $0x1], 0 }
   0x8   :  { %17 = vsyncpa [#allocation6], 0 }
   0x9   :  { %19 = vsyncpa [#allocation6 + $0x1], 0 }
   0xa   :  { %20 = vsyncpa [#allocation9], 0 }
   0xb   :  { %21 = vsyncpa [#allocation12], 0 }
   0xc   :  { %22 = vsyncpa [#allocation4], 0 }
   0xd   :  { %24 = vsyncpa [#allocation4 + $0x1], 0  ;;  %s1942_s30 = smov 0   ;;  %s1944_s10 = smov 0  }
   0xe   :  { %s1946_s11 = smov 0   ;;  %s1948_s12 = smov 0  }
   0xf LB: > { %2410 = sst [smem:[#allocation20_spill]] %s1863_s30  ;;  %s1877_s13 = smov [#allocation8]   ;;  %s1875_s12 = sphi %s1948_s12, %s2449_s12   ;;  %s1871_s11 = sphi %s1946_s11, %s2451_s11   ;;  %s1867_s10 = sphi %s1944_s10, %s2453_s10   ;;  %s1863_s30 = sphi %s1942_s30, %s2452_s30  }
  0x10   : > { %2411 = sst [smem:[#allocation21_spill]] %s1871_s11  ;;  %s282_s14 = sshll.u32 %s1877_s13, 4  ;;  %s1968_s14 = int_to_ptr.vmem [resolvable:$true] %s282_s14 }
  0x11   : > { %s1963_s15 = sadd.s32 4294967295, %s1875_s12   ;;  %p1295_p0 = scmp.ge.s32.totalorder %s1875_s12, 1 }
  0x12   : > { %p2389_p1 = scmp.eq.s32.totalorder %s1963_s15, 0  ;;  %p270_p2 = scmp.lt.s32.totalorder %s1875_s12, 3 }
  0x13   : > { %s1878_s17 = smov [#allocation11]   ;;  %s2414_s4 = sld [smem:[#allocation27_spill]] }
  0x14   : > { %p1970_p3 = pnand %p1295_p0, %p270_p2  ;;  %s308_s18 = sshll.u32 %s1878_s17, 4  ;;  %s1983_s18 = int_to_ptr.vmem [resolvable:$true] %s308_s18 }
  0x16   : > { %s2412_s16 = scalar_select %p1970_p3, 1, 0 }
  0x17   : > { %p1499_p5 = pneg %p1970_p3 }
  0x19   : > { %p1979_p6 = pnand %p1499_p5, %p2389_p1  ;;  %s1595_s22 = scalar_lea.hbm %s2414_s4, 512 }
  0x1a   : > { %p1596_p7 = scmp.ne.s32.totalorder %s2414_s4, %s1595_s22  ;;  %p1602_p11 = scmp.lt.u32.totalorder %s1595_s22, %s2414_s4 }
  0x1b   : > { %s2413_s19 = scalar_select %p1979_p6, 1, 0 }
  0x1c   : > { %p1993_p8 = pneg %p1979_p6 }
  0x1e   : > { %s2415_s25 = scalar_select %p1993_p8, 1, 0 }
  0x1f   : > { %p1598_p9 = pnand %p1993_p8, %p1596_p7 }
  0x21   : > { %p1599_p10 = pneg %p1598_p9 }
  0x23   : > { %p1604_p12 = pnand %p1602_p11, %p1599_p10 }
  0x25   : > { %1607 = shalt.err (!%p1604_p12)
}
  0x26   : > { %s1608_s28 = scalar_lea.vmem %s1968_s14, 512  ;;  %p1616_p5 = scmp.lt.s32.totalorder %s1968_s14, %s1968_s14 }
  0x27   : > { %p1609_p13 = scmp.ne.s32.totalorder %s1968_s14, %s1608_s28  ;;  %p1617_p4 = scmp.lt.s32.totalorder %s1608_s28, %s1608_s28 }
  0x29   : > { %p1611_p0 = pnand %p1609_p13, %p1993_p8  ;;  %p1618_p7 = por %p1617_p4, %p1616_p5 }
  0x2b   : > { %p1612_p2 = pneg %p1611_p0 }
  0x2d   : > { %p1619_p9 = pnand %p1618_p7, %p1612_p2 }
  0x2f   : > { %1622 = shalt.err (!%p1619_p9)
}
  0x30   : > { %s2379_s29 = smov 128   ;;  %s2381_s13 = smov 8  }
  0x31   : > { %1502 = dma.hbm_to_vmem [thread:$0]  (!%p1979_p6), %s2414_s4, 512, %s1968_s14, [#allocation9], %s2379_s29, %s2379_s29, %s2381_s13  }
  0x32   : > { %s2416_s6 = sld [smem:[#allocation28_spill]] }
  0x38   : > { %s1623_s23 = scalar_lea.hbm %s2416_s6, 512 }
  0x39   : > { %p1624_p4 = scmp.ne.s32.totalorder %s2416_s6, %s1623_s23  ;;  %p1630_p12 = scmp.lt.u32.totalorder %s1623_s23, %s2416_s6 }
  0x3b   : > { %p1626_p10 = pnand %p1624_p4, %p1993_p8 }
  0x3d   : > { %p1627_p11 = pneg %p1626_p10 }
  0x3f   : > { %p1632_p13 = pnand %p1630_p12, %p1627_p11 }
  0x41   : > { %1635 = shalt.err (!%p1632_p13)
}
  0x42   : > { %s1636_s14 = scalar_lea.vmem %s1983_s18, 512  ;;  %p1644_p7 = scmp.lt.s32.totalorder %s1983_s18, %s1983_s18 }
  0x43   : > { %p1637_p0 = scmp.ne.s32.totalorder %s1983_s18, %s1636_s14  ;;  %p1645_p9 = scmp.lt.s32.totalorder %s1636_s14, %s1636_s14 }
  0x45   : > { %p1639_p2 = pnand %p1637_p0, %p1993_p8  ;;  %p1646_p4 = por %p1645_p9, %p1644_p7 }
  0x47   : > { %p1640_p5 = pneg %p1639_p2 }
  0x49   : > { %p1647_p10 = pnand %p1646_p4, %p1640_p5 }
  0x4b   : > { %1650 = shalt.err (!%p1647_p10)
}
  0x4c   : > { %1508 = dma.hbm_to_vmem [thread:$0]  (!%p1979_p6), %s2416_s6, 512, %s1983_s18, [#allocation12], %s2379_s29, %s2379_s29, %s2381_s13  }
  0x4d   : > { %s1294_s21 = sadd.s32 4294967294, %s1875_s12   ;;  %s2045_s22 = sadd.s32 1, %s1875_s12  }
  0x4e   : > { %2417 = sst [smem:[#allocation22_spill]] %s2045_s22  ;;  %s34_s23 = ssub.s32 %s1875_s12, %s2045_s22 }
  0x4f   : > { %s37_s24 = sadd.s32 1, %s1871_s11  ;;  %p35_p11 = scmp.eq.s32.totalorder %s34_s23, 0 }
  0x50   : > { %p44_p12 = scmp.ne.s32.totalorder %s1871_s11, %s1867_s10  ;;  %p45_p13 = scmp.eq.s32.totalorder %s1875_s12, 0 }
  0x51   : > { %p50_p0 = scmp.ne.s32.totalorder %s1867_s10, %s1863_s30  ;;  %p257_p7 = scmp.eq.s32.totalorder %s1963_s15, 1 }
  0x52   : > { %s2056_s26 = scalar_select %p35_p11, %s1871_s11, %s37_s24  }
  0x53   : > { %p46_p2 = por %p45_p13, %p44_p12  ;;  %p2060_p5 = por %p2389_p1, %p50_p0 }
  0x54   : > { %2418 = sst [smem:[#allocation23_spill]] %s2056_s26  ;;  %p263_p9 = scmp.eq.s32.totalorder %s1294_s21, 1 }
  0x55   : > { %s2419_s27 = scalar_select %p2060_p5, 1, 0 }
  0x56   : > { %p1530_p4 = scmp.lt.s32.totalorder %s1875_s12, 2  ;;  %s2067_s18 = sand.u32 1, %s1871_s11  }
  0x57   : > { %p2069_p10 = por %p257_p7, %p44_p12  ;;  %p2073_p11 = por %p263_p9, %p50_p0 }
  0x58   : > { %s2387_s17 = sshll.u32 %s2067_s18, 3  ;;  %s2388_s20 = sshll.u32 %s1875_s12, 7 }
  0x59   : > { %s2420_s28 = scalar_select %p2069_p10, 1, 0 }
  0x5a   : > { %s2422_s14 = scalar_select %p2073_p11, 1, 0 }
  0x5b   : > { %2421 = sst [smem:[#allocation24_spill]] %s2420_s28  ;;  %p2079_p13 = pnand %p1530_p4, %p46_p2 }
  0x5c   : > { %2423 = sst [smem:[#allocation25_spill]] %s2422_s14  ;;  %s356_s21 = sand.u32 1, %s1875_s12  }
  0x5d   : > { %s2424_s23 = scalar_select %p2079_p13, 1, 0 }
  0x5e   : > { %s2425_s1 = sld [smem:[#allocation26_spill]]  ;;  %s360_s4 = scalar_lea.vmem [#allocation5], %s2387_s17 }
  0x5f   : > { %s367_s6 = sshll.u32 %s360_s4, 4  ;;  %s1305_s26 = sshll.u32 %s2067_s18, 5  ;;  %s2094_s6 = int_to_ptr.vmem [resolvable:$true] %s367_s6 }
  0x60   : > { %s2096_s11 = scalar_lea.sflag [#allocation6], %s356_s21  ;;  %p2102_p0 = pneg %p2079_p13 }
  0x62   : > { %s2426_s14 = scalar_select %p2102_p0, 1, 0 }
  0x64   : > { %s2089_s13 = scalar_lea.hbm %s2425_s1, %s2388_s20  ;;  %s1656_s4 = scalar_lea.hbm %s2425_s1, 256 }
  0x65   : > { %s1651_s22 = scalar_lea.hbm %s2089_s13, 128  ;;  %p1657_p9 = scmp.lt.u32.totalorder %s2089_s13, %s2425_s1 }
  0x66   : > { %p1652_p12 = scmp.ne.s32.totalorder %s2089_s13, %s1651_s22  ;;  %p1658_p4 = scmp.lt.u32.totalorder %s1656_s4, %s1651_s22 }
  0x67   : > { %p1660_p11 = scmp.lt.u32.totalorder %s1651_s22, %s2089_s13 }
  0x68   : > { %p1654_p2 = pnand %p2102_p0, %p1652_p12  ;;  %p1659_p1 = por %p1658_p4, %p1657_p9 }
  0x6a   : > { %p1655_p7 = pneg %p1654_p2  ;;  %p1661_p10 = por %p1660_p11, %p1659_p1 }
  0x6c   : > { %p1662_p5 = pnand %p1661_p10, %p1655_p7 }
  0x6e   : > { %1665 = shalt.err (!%p1662_p5)
}
  0x6f   : > { %s1666_s21 = scalar_lea.vmem %s2094_s6, 128  ;;  %s1881_s29 = smov [#allocation5]  }
  0x70   : > { %p1667_p12 = scmp.ne.s32.totalorder %s2094_s6, %s1666_s21  ;;  %s1671_s24 = sshll.u32 %s1881_s29, 4  ;;  %s1672_s24 = int_to_ptr.vmem [resolvable:$false] %s1671_s24 }
  0x71   : > { %s1673_s17 = scalar_lea.vmem %s1672_s24, 256  ;;  %p1674_p6 = scmp.lt.s32.totalorder %s2094_s6, %s1672_s24 }
  0x72   : > { %p1669_p2 = pnand %p1667_p12, %p2102_p0  ;;  %p1675_p8 = scmp.lt.s32.totalorder %s1673_s17, %s1666_s21 }
  0x74   : > { %p1670_p3 = pneg %p1669_p2  ;;  %p1676_p9 = por %p1675_p8, %p1674_p6 }
  0x76   : > { %p1677_p4 = pnand %p1676_p9, %p1670_p3 }
  0x78   : > { %1680 = shalt.err (!%p1677_p4)
}
  0x79   : > { %1518 = dma.hbm_to_vmem [thread:$0]  (!%p2079_p13), %s2089_s13, 128, %s2094_s6, %s2096_s11  }
  0x7a   : > { %s378_s22 = scalar_lea.vmem [#allocation7], %s1305_s26  ;;  %s1882_s4 = smov [#allocation10]  }
  0x7b   : > { %s385_s20 = sshll.u32 %s378_s22, 4  ;;  %s295_s29 = sshll.u32 %s1882_s4, 4  ;;  %s2128_s20 = int_to_ptr.vmem [resolvable:$true] %s385_s20  ;;  %s296_s29 = int_to_ptr.vmem [resolvable:$true] %s295_s29 }
  0x7c   : > { %s1681_s17 = scalar_lea.hbm %s2374_s5, 512  ;;  %p2427_p3 = scmp.ne.s32.totalorder %s2415_s25, 0 }
  0x7d   : > { %p1682_p1 = scmp.ne.s32.totalorder %s2374_s5, %s1681_s17  ;;  %p1688_p5 = scmp.lt.u32.totalorder %s1681_s17, %s2374_s5 }
  0x7f   : > { %p1684_p6 = pnand %p1682_p1, %p2427_p3 }
  0x81   : > { %p1685_p8 = pneg %p1684_p6 }
  0x83   : > { %p1690_p10 = pnand %p1688_p5, %p1685_p8 }
  0x85   : > { %1693 = shalt.err (!%p1690_p10)
}
  0x86   : > { %s1694_s26 = scalar_lea.vmem %s296_s29, 512  ;;  %p1702_p2 = scmp.lt.s32.totalorder %s296_s29, %s296_s29 }
  0x87   : > { %p1695_p11 = scmp.ne.s32.totalorder %s296_s29, %s1694_s26  ;;  %p1703_p9 = scmp.lt.s32.totalorder %s1694_s26, %s1694_s26 }
  0x89   : > { %p1697_p7 = pnand %p1695_p11, %p2427_p3  ;;  %p1704_p4 = por %p1703_p9, %p1702_p2 }
  0x8b   : > { %p1698_p12 = pneg %p1697_p7 }
  0x8d   : > { %p1705_p13 = pnand %p1704_p4, %p1698_p12 }
  0x8f   : > { %1708 = shalt.err (!%p1705_p13)
}
  0x90   : > { %p2428_p1 = scmp.ne.s32.totalorder %s2413_s19, 0  ;;  %s2429_s1 = smov 8  }
  0x91   : > { %s2430_s30 = smov 128   ;;  %s1883_s21 = smov [#allocation13]  }
  0x92   : > { %1505 = dma.hbm_to_vmem [thread:$0]  (!%p2428_p1), %s2374_s5, 512, %s296_s29, [#allocation9], %s2430_s30, %s2430_s30, %s2429_s1  }
  0x93   : > { %s321_s24 = sshll.u32 %s1883_s21, 4  ;;  %s1709_s13 = scalar_lea.hbm %s2376_s7, 512  ;;  %s322_s24 = int_to_ptr.vmem [resolvable:$true] %s321_s24 }
  0x94   : > { %p1710_p13 = scmp.ne.s32.totalorder %s2376_s7, %s1709_s13  ;;  %p1716_p5 = scmp.lt.u32.totalorder %s1709_s13, %s2376_s7 }
  0x96   : > { %p1712_p6 = pnand %p1710_p13, %p2427_p3 }
  0x98   : > { %p1713_p8 = pneg %p1712_p6 }
  0x9a   : > { %p1718_p10 = pnand %p1716_p5, %p1713_p8 }
  0x9c   : > { %1721 = shalt.err (!%p1718_p10)
}
  0x9d   : > { %s1722_s29 = scalar_lea.vmem %s322_s24, 512  ;;  %p1730_p2 = scmp.lt.s32.totalorder %s322_s24, %s322_s24 }
  0x9e   : > { %p1723_p11 = scmp.ne.s32.totalorder %s322_s24, %s1722_s29  ;;  %p1731_p9 = scmp.lt.s32.totalorder %s1722_s29, %s1722_s29 }
  0xa0   : > { %p1725_p7 = pnand %p1723_p11, %p2427_p3  ;;  %p1732_p4 = por %p1731_p9, %p1730_p2 }
  0xa2   : > { %p1726_p12 = pneg %p1725_p7 }
  0xa4   : > { %p1733_p0 = pnand %p1732_p4, %p1726_p12 }
  0xa6   : > { %1736 = shalt.err (!%p1733_p0)
}
  0xa7   : > { %1511 = dma.hbm_to_vmem [thread:$0]  (!%p2428_p1), %s2376_s7, 512, %s322_s24, [#allocation12], %s2430_s30, %s2430_s30, %s2429_s1  }
  0xa8   : > { %s2431_s25 = sshll.u32 %s1875_s12, 7  ;;  %s2432_s21 = sshll.u32 %s2067_s18, 3 }
  0xa9   : > { %s2177_s4 = scalar_lea.hbm %s2369_s0, %s2431_s25  ;;  %s342_s19 = scalar_lea.vmem [#allocation2], %s2432_s21 }
  0xaa   : > { %s349_s17 = sshll.u32 %s342_s19, 4  ;;  %s1343_s6 = sshll.u32 %s1875_s12, 9  ;;  %s2181_s17 = int_to_ptr.vmem [resolvable:$true] %s349_s17 }
  0xab   : > { %s339_s13 = scalar_lea.sflag [#allocation3], %s2067_s18  ;;  %s1737_s26 = scalar_lea.hbm %s2177_s4, 128 }
  0xac   : > { %p1738_p0 = scmp.ne.s32.totalorder %s2177_s4, %s1737_s26  ;;  %p2433_p3 = scmp.ne.s32.totalorder %s2426_s14, 0 }
  0xad   : > { %s1742_s8 = scalar_lea.hbm %s2369_s0, 256  ;;  %p1743_p6 = scmp.lt.u32.totalorder %s2177_s4, %s2369_s0 }
  0xae   : > { %p1740_p1 = pnand %p1738_p0, %p2433_p3  ;;  %p1744_p8 = scmp.lt.u32.totalorder %s1742_s8, %s1737_s26 }
  0xaf   : > { %p1746_p10 = scmp.lt.u32.totalorder %s1737_s26, %s2177_s4 }
  0xb0   : > { %p1741_p13 = pneg %p1740_p1  ;;  %p1745_p5 = por %p1744_p8, %p1743_p6 }
  0xb2   : > { %p1747_p11 = por %p1746_p10, %p1745_p5 }
  0xb4   : > { %p1748_p7 = pnand %p1747_p11, %p1741_p13 }
  0xb6   : > { %1751 = shalt.err (!%p1748_p7)
}
  0xb7   : > { %s1752_s18 = scalar_lea.vmem %s2181_s17, 128  ;;  %s1884_s28 = smov [#allocation2]  }
  0xb8   : > { %p1753_p12 = scmp.ne.s32.totalorder %s2181_s17, %s1752_s18  ;;  %s1757_s22 = sshll.u32 %s1884_s28, 4  ;;  %s1758_s22 = int_to_ptr.vmem [resolvable:$false] %s1757_s22 }
  0xb9   : > { %s1759_s21 = scalar_lea.vmem %s1758_s22, 256  ;;  %p1760_p4 = scmp.lt.s32.totalorder %s2181_s17, %s1758_s22 }
  0xba   : > { %p1755_p2 = pnand %p1753_p12, %p2433_p3  ;;  %p1761_p0 = scmp.lt.s32.totalorder %s1759_s21, %s1752_s18 }
  0xbc   : > { %p1756_p9 = pneg %p1755_p2  ;;  %p1762_p1 = por %p1761_p0, %p1760_p4 }
  0xbe   : > { %p1763_p6 = pnand %p1762_p1, %p1756_p9 }
  0xc0   : > { %1766 = shalt.err (!%p1763_p6)
}
  0xc1   : > { %p2434_p13 = scmp.ne.s32.totalorder %s2424_s23, 0  ;;  %s2211_s24 = scalar_lea.hbm %s2371_s2, %s1343_s6 }
  0xc2   : > { %s1767_s29 = scalar_lea.hbm %s2211_s24, 512  ;;  %s1772_s25 = scalar_lea.hbm %s2371_s2, 1024 }
  0xc3   : > { %1515 = dma.hbm_to_vmem [thread:$0]  (!%p2434_p13), %s2177_s4, 128, %s2181_s17, %s339_s13  }
  0xc4   : > { %p1768_p8 = scmp.ne.s32.totalorder %s2211_s24, %s1767_s29  ;;  %p1773_p11 = scmp.lt.u32.totalorder %s2211_s24, %s2371_s2 }
  0xc5   : > { %p1774_p7 = scmp.lt.u32.totalorder %s1772_s25, %s1767_s29  ;;  %p1776_p2 = scmp.lt.u32.totalorder %s1767_s29, %s2211_s24 }
  0xc6   : > { %p1770_p5 = pnand %p1768_p8, %p2433_p3 }
  0xc7   : > { %p1775_p12 = por %p1774_p7, %p1773_p11 }
  0xc8   : > { %p1771_p10 = pneg %p1770_p5 }
  0xc9   : > { %p1777_p9 = por %p1776_p2, %p1775_p12 }
  0xcb   : > { %p1778_p4 = pnand %p1777_p9, %p1771_p10 }
  0xcd   : > { %1781 = shalt.err (!%p1778_p4)
}
  0xce   : > { %s1782_s6 = scalar_lea.vmem %s2128_s20, 512  ;;  %s1885_s13 = smov [#allocation7]  }
  0xcf   : > { %p1783_p0 = scmp.ne.s32.totalorder %s2128_s20, %s1782_s6  ;;  %s1787_s18 = sshll.u32 %s1885_s13, 4  ;;  %s1788_s18 = int_to_ptr.vmem [resolvable:$false] %s1787_s18 }
  0xd0   : > { %s1789_s28 = scalar_lea.vmem %s1788_s18, 1024  ;;  %p1790_p8 = scmp.lt.s32.totalorder %s2128_s20, %s1788_s18 }
  0xd1   : > { %p1785_p1 = pnand %p1783_p0, %p2433_p3  ;;  %p1791_p5 = scmp.lt.s32.totalorder %s1789_s28, %s1782_s6 }
  0xd3   : > { %p1786_p6 = pneg %p1785_p1  ;;  %p1792_p11 = por %p1791_p5, %p1790_p8 }
  0xd5   : > { %p1793_p7 = pnand %p1792_p11, %p1786_p6 }
  0xd7   : > { %1796 = shalt.err (!%p1793_p7)
}
  0xd8   : > { %1521 = dma.hbm_to_vmem [thread:$0]  (!%p2434_p13), %s2211_s24, 512, %s2128_s20, %s2096_s11, %s2430_s30, %s2430_s30, %s2429_s1  }
  0xd9   : > { %p2435_p3 = scmp.ne.s32.totalorder %s2412_s16, 0 }
  0xda   : > { %s2241_s14 = sand.u32 (!%p2435_p3), 1, %s1867_s10   ;;  %p2436_p10 = scmp.ne.s32.totalorder (!%p2435_p3), %s2419_s27, 0 }
  0xdb   : > { %403 = sbr.rel (%p2435_p3) target bundleno = 1450 (0x5aa), region = 56  ;;  %s1309_s22 = sshll.u32 (!%p2435_p3), %s2241_s14, 3 }
  0xdc   : > { %s406_s21 = scalar_lea.sflag (!%p2435_p3), [#allocation3], %s2241_s14  ;;  %s2245_s19 = scalar_lea.vmem (!%p2435_p3), [#allocation2], %s1309_s22 }
  0xe2   : > { %1842 = dma.done.wait (%p2436_p10), %s406_s21, 128  }
  0xe3   : > { %1844 = vsyncadd (%p2436_p10), %s406_s21, 4294967168  ;;  %s414_s11 = sand.u32 1, %s1963_s15   ;;  %s2252_s23 = scalar_lea.vmem [#allocation5], %s1309_s22 }
  0xe4   : > { %s415_s16 = scalar_lea.sflag [#allocation6], %s414_s11 }
  0xe5   : > { %1846 = dma.done.wait (%p2436_p10), %s415_s16, 640  }
  0xe6   : > { %1848 = vsyncadd (%p2436_p10), %s415_s16, 4294966656  ;;  %s1311_s20 = sshll.u32 %s2241_s14, 5  ;;  %p2437_p13 = scmp.eq.s32.totalorder %s1963_s15, 0 }
  0xe7   : > { %s2261_s1 = scalar_lea.vmem [#allocation7], %s1311_s20 }
  0xe8   : > { %1850 = dma.done.wait (%p2437_p13), [#allocation9], 1024   ;;  %p2438_p12 = pmov %p2437_p13 }
  0xea   : > { %1852 = vsyncadd (%p2438_p12), [#allocation9], 4294966272  ;;  %p2439_p2 = pmov %p2438_p12 }
  0xec   : > { %1854 = dma.done.wait (%p2439_p2), [#allocation12], 1024   ;;  %p2440_p9 = pmov %p2439_p2 }
  0xed   : > { %v1886_v0 = vmov 0.0|0.0   ;;  %vm1887_vm0 = vmmov 0   ;;  %v1888_v1 = vmov 0.0   ;;  %v501_v2 = vld [vmem:[#allocation8] sm:$0xff]  ;;  %v502_v3 = vld [vmem:[#allocation8 + $0x8] sm:$0xff]  ;;  %v503_v7 = vld [vmem:[#allocation8 + $0x10] sm:$0xff] }
  0xee   : > { %1856 = vsyncadd (%p2440_p9), [#allocation12], 4294966272  ;;  %1447 = vmatprep.subr.bf16.mxu0 %v1886_v0  ;;  %1453 = vmatprep.subr.bf16.mxu1 %v1886_v0  ;;  %v579_v4 = vld [vmem:[#allocation10] sm:$0xff]  ;;  %v1448_v5 = vpack.c.bf16 %v502_v3, %v501_v2  ;;  %v580_v6 = vld [vmem:[#allocation10 + $0x8] sm:$0xff]  ;;  %vm505_vm1 = vcmask 261120   ;;  %p491_p4 = scmp.lt.s32.totalorder %s1963_s15, 1 }
  0xef   : > { %1389 = vmatprep.mubr.msk.f32.mxu0 %vm1887_vm0, %v1888_v1  ;;  %1400 = vmatprep.mubr.msk.f32.mxu1 %vm1887_vm0, %v1888_v1  ;;  %v504_v8 = vld [vmem:[#allocation8 + $0x18] sm:$0xff]  ;;  %v1454_v9 = vpack.c.bf16 %v580_v6, %v579_v4  ;;  %v581_v10 = vld [vmem:[#allocation10 + $0x10] sm:$0xff]  ;;  %v656_v13 = vld [vmem:[#allocation11] sm:$0xff]  ;;  %vm863_vm2 = vcmask 64512   ;;  %s2441_s9 = sld [smem:[#allocation29_spill]]  ;;  %s490_s25 = scalar_lea.vmem [#allocation14], %s1311_s20 }
  0xf0   : > { %v582_v11 = vld [vmem:[#allocation10 + $0x18] sm:$0xff]  ;;  %1449 = vmatpush3.bf16.msra.mxu0 %v1448_v5  ;;  %v1451_v12 = vpack.c.bf16 %v504_v8, %v503_v7  ;;  %v657_v14 = vld [vmem:[#allocation11 + $0x8] sm:$0xff]  ;;  %v658_v17 = vld [vmem:[#allocation11 + $0x10] sm:$0xff]  ;;  %s492_s27 = scalar_select %p491_p4, %s1963_s15, 1 }
  0xf1   : > { %1455 = vmatpush3.bf16.msra.mxu1 %v1454_v9  ;;  %1450 = vmatprep.subr.bf16.mxu0 %v1886_v0  ;;  %v1457_v15 = vpack.c.bf16 %v582_v11, %v581_v10  ;;  %v1459_v16 = vpack.c.bf16 %v657_v14, %v656_v13  ;;  %v659_v18 = vld [vmem:[#allocation11 + $0x18] sm:$0xff]  ;;  %v494_v19 = vld [vmem:[%s2245_s19] sm:$0xff]  ;;  %v498_v24 = vld [vmem:[%s2261_s1 + $0x10] sm:$0xff]  ;;  %s1131_s4 = sshll.u32 %s490_s25, 4  ;;  %s2442_s17 = sld [smem:[#allocation24_spill]]  ;;  %s2317_s4 = int_to_ptr.vmem [resolvable:$true] %s1131_s4 }
  0xf2   : > { %1456 = vmatprep.subr.bf16.mxu1 %v1886_v0  ;;  %v495_v20 = vld [vmem:[%s2252_s23] sm:$0xff]  ;;  %v1463_v21 = vpack.c.bf16 %v659_v18, %v658_v17  ;;  %v496_v22 = vld [vmem:[%s2261_s1] sm:$0xff]  ;;  %v497_v23 = vld [vmem:[%s2261_s1 + $0x8] sm:$0xff]  ;;  %s493_s24 = scalar_lea.vmem %s2372_s3, %s492_s27  ;;  %s1344_s6 = sshll.u32 %s1963_s15, 9 }
  0xf3   : > { %v499_v25 = vld [vmem:[%s2261_s1 + $0x18] sm:$0xff]  ;;  %v1323_v34 = vld [vmem:[%s493_s24] ss:$0 sm:$0xff]  ;;  %v1006_v4 = vld [vmem:[#allocation13 + $0x8] sm:$0xff]  ;;  %s2443_s28 = sld [smem:[#allocation30_spill]]  ;;  %s1118_s15 = scalar_lea.sflag [#allocation4], %s2241_s14 }
  0xf4   : > { %1452 = vmatpush3.bf16.msra.mxu0 %v1451_v12  ;;  %v1005_v3 = vld [vmem:[#allocation13] sm:$0xff]  ;;  %v1007_v5 = vld [vmem:[#allocation13 + $0x10] sm:$0xff]  ;;  %v1008_v7 = vld [vmem:[#allocation13 + $0x18] sm:$0xff]  ;;  %s1797_s21 = scalar_lea.vmem %s2317_s4, 512  ;;  %s1889_s19 = smov [#allocation14]  }
  0xf5   : > { %1458 = vmatpush3.bf16.msra.mxu1 %v1457_v15  ;;  %1460 = vmatprep.subr.bf16.mxu0 %v1459_v16  ;;  %v1467_v6 = vpack.c.bf16 %v1006_v4, %v1005_v3  ;;  %v1471_v8 = vpack.c.bf16 %v1008_v7, %v1007_v5  ;;  %p1798_p0 = scmp.ne.s32.totalorder %s2317_s4, %s1797_s21  ;;  %s1801_s11 = sshll.u32 %s1889_s19, 4  ;;  %s1802_s11 = int_to_ptr.vmem [resolvable:$false] %s1801_s11 }
  0xf6   : > { %s1803_s16 = scalar_lea.vmem %s1802_s11, 1024  ;;  %p1804_p5 = scmp.lt.s32.totalorder %s2317_s4, %s1802_s11 }
  0xf7   : > { %1390 = vmatmul.mubr.msk.f32.vlgmr.msra.gmra.mrb[0].mxu0 %vm505_vm1, %v494_v19  ;;  %p2444_p1 = scmp.ne.s32.totalorder %s2442_s17, 0  ;;  %p1805_p11 = scmp.lt.s32.totalorder %s1803_s16, %s1797_s21 }
  0xf8   : > { %1401 = vmatmul.mubr.msk.f32.vlgmr.msra.gmra.mrb[0].mxu1 %vm505_vm1, %v495_v20  ;;  %1462 = vmatpush3.bf16.msra.mxu0 %v1459_v16 }
  0xf9   : > { %1464 = vmatprep.subr.bf16.mxu0 %v1463_v21  ;;  %1411 = vmatprep.mubr.msk.f32.mxu0 %vm505_vm1, %v496_v22  ;;  %s2323_s22 = scalar_lea.hbm %s2443_s28, %s1344_s6  ;;  %p1799_p6 = pnand %p1798_p0, %p2444_p1 }
  0xfa   : > { %p1806_p7 = por %p1805_p11, %p1804_p5 }
  0xfb   : > { %p1800_p8 = pneg %p1799_p6 }
  0xfc   : > { %1466 = vmatpush3.bf16.msra.mxu0 %v1463_v21 }
  0xfd   : > { %1468 = vmatprep.subr.bf16.mxu0 %v1467_v6  ;;  %p1807_p3 = pnand %p1806_p7, %p1800_p8 }
  0xff   : > { %1412 = vmatmul.mubr.msk.f32.vlgmr.msra.gmra.mrb[2].mxu0 %vm505_vm1, %v497_v23 }
 0x100   : > { %1414 = vmatprep.mubr.msk.f32.mxu0 %vm505_vm1, %v498_v24  ;;  %1470 = vmatpush3.bf16.msra.mxu0 %v1467_v6 }
 0x101   : > { %1472 = vmatprep.subr.bf16.mxu0 %v1471_v8 }
 0x103   : > { %1415 = vmatmul.mubr.msk.f32.gmra.mrb[4].mxu0 %vm505_vm1, %v499_v25  ;;  %v1333_v25 = vld [vmem:[%s2441_s9] ss:$0 sm:$0xff] }
 0x104   : > { %1474 = vmatpush3.bf16.msra.mxu0 %v1471_v8 }
 0x1ca   : > { %v575_v26 = vpop.f32.mrb[0].mxu0 }
 0x1cb   : > { %v652_v27 = vpop.f32.mrb[0].mxu1  ;;  %v1391_v28 = vpop.f32.mrb[1].mxu0 }
 0x1cc   : > { %1417 = vmatprep.subr.msk.mxu1 %vm505_vm1, %v652_v27  ;;  %v1402_v29 = vpop.f32.mrb[1].mxu1 }
 0x1cd   : > { %1418 = vmatpush3.xpose.msk.msra.mxu1 %vm505_vm1, %v652_v27 }
 0x1ce   : > { %1425 = vmatprep.subr.mxu1 %v575_v26 }
 0x1d2   : > { %v1413_v30 = vpop.f32.mrb[2].mxu0 }
 0x1d3   : > { %v738_v31 = vpop.f32.mrb[3].mxu0 }
 0x1d4   : > { %1419 = vmatprep.mubr.msk.f32.mxu1 %vm505_vm1, %v738_v31 }
 0x1d5   : > { %1420 = vmatmul.mubr.msk.f32.vlgmr.msra.gmra.mrb[2].mxu1 %vm505_vm1, %v1413_v30 }
 0x1d6   : > { %1426 = vmatpush3.msra.mxu1 %v575_v26  ;;  %v1416_v32 = vpop.f32.mrb[4].mxu0 }
 0x1d7   : > { %v748_v33 = vpop.f32.mrb[5].mxu0 }
 0x1d8   : > { %1422 = vmatprep.mubr.msk.f32.mxu1 %vm505_vm1, %v748_v33 }
 0x1d9   : > { %1423 = vmatmul.mubr.msk.f32.gmra.mrb[4].mxu1 %vm505_vm1, %v1416_v32 }
 0x2a8   : > { %v1421_v35 = vpop.f32.mrb[2].mxu1 }
 0x2a9   : > { %v844_v36 = vpop.f32.mrb[3].mxu1  ;;  %v850_v38 = vadd.f32 %v1421_v35, %v1323_v34 }
 0x2aa   : > { %v845_v37 = vadd.f32 %v1323_v34, %v844_v36 }
 0x2ab   : > { %v867_v44 = vsel %vm863_vm2, %v850_v38, -inf }
 0x2ac   : > { %v1424_v39 = vpop.f32.mrb[4].mxu1  ;;  %v864_v40 = vsel %vm863_vm2, %v845_v37, -inf }
 0x2ad   : > { %865 = vmax.xlane.f32.xlu0 %v864_v40  ;;  %v854_v41 = vpop.f32.mrb[5].mxu1  ;;  %v860_v43 = vadd.f32 %v1424_v39, %v1323_v34 }
 0x2ae   : > { %v855_v42 = vadd.f32 %v1323_v34, %v854_v41 }
 0x2af   : > { %v873_v46 = vsel %vm863_vm2, %v860_v43, -inf }
 0x2b0   : > { %v870_v45 = vsel %vm863_vm2, %v855_v42, -inf }
 0x2b1   : > { %868 = vmax.xlane.f32.xlu0 %v867_v44  ;;  %871 = vmax.xlane.f32.xlu1 %v870_v45 }
 0x2b5   : > { %874 = vmax.xlane.f32.xlu1 %v873_v46 }
 0x33a   : > { %v866_v47 = vpop.xlane.xlu0 %865 }
 0x33b   : > { %v876_v48 = vsub.f32 %v845_v37, %v866_v47 }
 0x33d   : > { %v880_v49 = vmul.f32 1.442695, %v876_v48 }
 0x33e   : > { %v869_v50 = vpop.xlane.xlu0 %868  ;;  %v872_v51 = vpop.xlane.xlu1 %871 }
 0x33f   : > { %1579 = vpow2.f32 %v880_v49  ;;  %v877_v52 = vsub.f32 %v850_v38, %v869_v50  ;;  %v878_v53 = vsub.f32 %v855_v42, %v872_v51 }
 0x341   : > { %v882_v54 = vmul.f32 1.442695, %v877_v52  ;;  %v884_v55 = vmul.f32 1.442695, %v878_v53 }
 0x342   : > { %v875_v56 = vpop.xlane.xlu1 %874 }
 0x343   : > { %1581 = vpow2.f32 %v882_v54  ;;  %v879_v57 = vsub.f32 %v860_v43, %v875_v56 }
 0x344   : > { %1583 = vpow2.f32 %v884_v55 }
 0x345   : > { %v886_v58 = vmul.f32 1.442695, %v879_v57 }
 0x347   : > { %1585 = vpow2.f32 %v886_v58 }
 0x349   : > { %v1580_v59 = vpop.eup %1579 }
 0x34a   : > { %v888_v60 = vsel %vm863_vm2, %v1580_v59, 0.0 }
 0x34b   : > { %889 = vadd.xlane.f32.xlu0 %v888_v60 }
 0x34d   : > { %v1582_v61 = vpop.eup %1581 }
 0x34e   : > { %v1584_v62 = vpop.eup %1583  ;;  %v891_v63 = vsel %vm863_vm2, %v1582_v61, 0.0 }
 0x34f   : > { %892 = vadd.xlane.f32.xlu1 %v891_v63  ;;  %v894_v0 = vsel %vm863_vm2, %v1584_v62, 0.0 }
 0x350   : > { %895 = vadd.xlane.f32.xlu0 %v894_v0 }
 0x351   : > { %v1586_v1 = vpop.eup %1585 }
 0x352   : > { %v897_v2 = vsel %vm863_vm2, %v1586_v1, 0.0 }
 0x353   : > { %898 = vadd.xlane.f32.xlu1 %v897_v2 }
 0x3d8   : > { %v890_v9 = vpop.xlane.xlu0 %889 }
 0x3d9   : > { %1587 = vrcp.f32 %v890_v9 }
 0x3dc   : > { %v893_v10 = vpop.xlane.xlu1 %892 }
 0x3dd   : > { %v896_v11 = vpop.xlane.xlu0 %895  ;;  %1589 = vrcp.f32 %v893_v10 }
 0x3de   : > { %1591 = vrcp.f32 %v896_v11 }
 0x3e0   : > { %v899_v12 = vpop.xlane.xlu1 %898 }
 0x3e1   : > { %1593 = vrcp.f32 %v899_v12 }
 0x3e3   : > { %v1588_v13 = vpop.eup %1587 }
 0x3e4   : > { %v904_v14 = vmul.f32 %v1588_v13, %v1580_v59 }
 0x3e6   : > { %1427 = vmatprep.mubr.msk.f32.mxu1 %vm863_vm2, %v904_v14 }
 0x3e7   : > { %v1590_v15 = vpop.eup %1589 }
 0x3e8   : > { %v1592_v16 = vpop.eup %1591  ;;  %v905_v17 = vmul.f32 %v1590_v15, %v1582_v61 }
 0x3e9   : > { %v906_v18 = vmul.f32 %v1592_v16, %v1584_v62 }
 0x3ea   : > { %1428 = vmatmul.mubr.msk.f32.vlgmr.msra.gmra.mrb[6].mxu1 %vm863_vm2, %v905_v17 }
 0x3eb   : > { %v1594_v19 = vpop.eup %1593  ;;  %1430 = vmatprep.mubr.msk.f32.mxu1 %vm863_vm2, %v906_v18 }
 0x3ec   : > { %v907_v20 = vmul.f32 %v1594_v19, %v1586_v1 }
 0x3ee   : > { %1431 = vmatmul.mubr.msk.f32.gmra.mrb[8].mxu1 %vm863_vm2, %v907_v20 }
 0x4bd   : > { %v1429_v21 = vpop.f32.mrb[6].mxu1 }
 0x4be   : > { %v986_v22 = vpop.f32.mrb[7].mxu1 }
 0x4bf   : > { %1441 = vmatprep.mubr.msk.f32.mxu0 %vm505_vm1, %v986_v22 }
 0x4c0   : > { %1442 = vmatmul.mubr.msk.f32.vlgmr.msra.gmra.mrb[6].mxu0 %vm505_vm1, %v1429_v21 }
 0x4c1   : > { %v1432_v23 = vpop.f32.mrb[8].mxu1 }
 0x4c2   : > { %v996_v24 = vpop.f32.mrb[9].mxu1 }
 0x4c3   : > { %1444 = vmatprep.mubr.msk.f32.mxu0 %vm505_vm1, %v996_v24 }
 0x4c4   : > { %1445 = vmatmul.mubr.msk.f32.gmra.mrb[8].mxu0 %vm505_vm1, %v1432_v23 }
 0x593   : > { %v1443_v26 = vpop.f32.mrb[6].mxu0 }
 0x594   : > { %v1100_v27 = vadd.f32 %v1443_v26, %v1333_v25  ;;  %v1094_v28 = vpop.f32.mrb[7].mxu0 }
 0x595   : > { %v1095_v29 = vadd.f32 %v1333_v25, %v1094_v28 }
 0x596   : > { %1114 = vst.msk [vmem:[%s490_s25 + $0x8] sm:$0xff] %vm505_vm1, %v1100_v27 }
 0x597   : > { %1113 = vst.msk [vmem:[%s490_s25] sm:$0xff] %vm505_vm1, %v1095_v29  ;;  %v1446_v30 = vpop.f32.mrb[8].mxu0 }
 0x598   : > { %v1110_v31 = vadd.f32 %v1446_v30, %v1333_v25  ;;  %v1104_v32 = vpop.f32.mrb[9].mxu0 }
 0x599   : > { %v1105_v33 = vadd.f32 %v1333_v25, %v1104_v32 }
 0x59a   : > { %1116 = vst.msk [vmem:[%s490_s25 + $0x18] sm:$0xff] %vm505_vm1, %v1110_v31 }
 0x59b   : > { %1115 = vst.msk [vmem:[%s490_s25 + $0x10] sm:$0xff] %vm505_vm1, %v1105_v33 }
 0x59c   : > { %1810 = shalt.err (!%p1807_p3)
}
 0x59d   : > { %s1811_s23 = scalar_lea.hbm %s2323_s22, 512  ;;  %s1815_s27 = scalar_lea.hbm %s2443_s28, 1024 }
 0x59e   : > { %p1812_p10 = scmp.ne.s32.totalorder %s2323_s22, %s1811_s23  ;;  %p1816_p2 = scmp.lt.u32.totalorder %s2323_s22, %s2443_s28 }
 0x59f   : > { %p1817_p9 = scmp.lt.u32.totalorder %s1815_s27, %s1811_s23  ;;  %p1819_p0 = scmp.lt.u32.totalorder %s1811_s23, %s2323_s22 }
 0x5a0   : > { %p1813_p13 = pnand %p1812_p10, %p2444_p1 }
 0x5a1   : > { %p1818_p4 = por %p1817_p9, %p1816_p2 }
 0x5a2   : > { %p1814_p12 = pneg %p1813_p13 }
 0x5a3   : > { %p1820_p6 = por %p1819_p0, %p1818_p4 }
 0x5a5   : > { %p1821_p8 = pnand %p1820_p6, %p1814_p12 }
 0x5a7   : > { %1824 = shalt.err (!%p1821_p8)
}
 0x5a8   : > { %s1890_s24 = smov 128   ;;  %s1891_s29 = smov 8  }
 0x5a9   : > { %1497 = dma.vmem_to_hbm [thread:$0]  (%p2444_p1), %s2317_s4, 512, %s2323_s22, %s1118_s15, %s1890_s24, %s1890_s24, %s1891_s29  }
 0x5aa PF: > { %s2445_s8 = sld [smem:[#allocation20_spill]]  ;;  %s2446_s9 = sld [smem:[#allocation25_spill]] }
 0x5ab   : > { %p2448_p11 = scmp.ge.s32.totalorder %s1875_s12, 2 }
 0x5b0   : > { %s1146_s25 = sand.u32 1, %s2445_s8   ;;  %p2447_p5 = scmp.ne.s32.totalorder %s2446_s9, 0 }
 0x5b1   : > { %s1147_s6 = scalar_lea.sflag [#allocation4], %s1146_s25 }
 0x5b2   : > { %p1523_p7 = pnand %p2448_p11, %p2447_p5 }
 0x5b4   : > { %1858 = dma.done.wait (!%p1523_p7), %s1147_s6, 512  }
 0x5b5   : > { %1860 = vsyncadd (!%p1523_p7), %s1147_s6, 4294966784  ;;  %s2449_s12 = sld [smem:[#allocation22_spill]]  ;;  %s2450_s13 = sld [smem:[#allocation21_spill]] }
 0x5b6   : > { %s2451_s11 = sld [smem:[#allocation23_spill]]  ;;  %s2452_s30 = smov %s1867_s10 }
 0x5bb   : > { %p27_p3 = scmp.ge.s32.totalorder %s2449_s12, 4   ;;  %s2453_s10 = smov %s2450_s13 }
 0x5bd   :  { %29 = sbr.rel (!%p27_p3) target bundleno = 15 (0xf), region = 144 }
 0x5c4   :  { %1152 = vsyncpa [#allocation3], 1 }
 0x5c5   :  { %1154 = vsyncpa [#allocation3 + $0x1], 1 }
 0x5c6   :  { %1155 = vsyncpa [#allocation6], 1 }
 0x5c7   :  { %1157 = vsyncpa [#allocation6 + $0x1], 1 }
 0x5c8   :  { %1158 = vsyncpa [#allocation9], 1 }
 0x5c9   :  { %1159 = vsyncpa [#allocation12], 1 }
 0x5ca   :  { %1160 = vsyncpa [#allocation4], 1 }
 0x5cb   :  { %1162 = vsyncpa [#allocation4 + $0x1], 1 }

</bundles_post_ra>
